<compile_context>
chip_gen: v6e
topology: v6e:2x2x1
jax: 0.10.0
libtpu: 0.0.40
codegen_flags: <defaults>
</compile_context>

<pallas_src>
import jax
import jax.numpy as jnp
from jax import lax
from jax.experimental import pallas as pl
from jax.experimental.pallas import tpu as pltpu


_NEG_BIG = -1e30  # finite "-inf" used to pad the bias for padded vocab columns


def _round_up(a, b):
    return (a + b - 1) // b * b


def _make_kernel(tv):
    def kernel(x_ref, w_ref, b_ref, o_ref, m_sc, l_sc):
        # x_ref : (tm, D)   bf16 row tile
        # w_ref : (tv, D)   bf16 weight tile in native [V, D] layout
        # b_ref : (1, tv)   f32 bias tile
        # o_ref : (tm, Vpad) f32 output row block (resident across vocab axis)
        # m_sc, l_sc : (tm, 1) f32 running max / running sum-of-exp
        j = pl.program_id(1)
        nv = pl.num_programs(1)

        @pl.when(j == 0)
        def _init():
            m_sc[...] = jnp.full(m_sc.shape, -jnp.inf, dtype=m_sc.dtype)
            l_sc[...] = jnp.zeros(l_sc.shape, dtype=l_sc.dtype)

        # logits[m, v] = sum_d x[m, d] * w[v, d]   (f32 accumulation on MXU)
        logits = lax.dot_general(
            x_ref[...],
            w_ref[...],
            dimension_numbers=(((1,), (1,)), ((), ())),
            preferred_element_type=jnp.float32,
        )
        logits = logits + b_ref[...]  # (1, tv) broadcasts to (tm, tv)

        # Online logsumexp update over the vocab tiles.
        m_prev = m_sc[...]
        m_new = jnp.maximum(m_prev, jnp.max(logits, axis=-1, keepdims=True))
        alpha = jnp.exp(m_prev - m_new)
        l_sc[...] = l_sc[...] * alpha + jnp.sum(
            jnp.exp(logits - m_new), axis=-1, keepdims=True
        )
        m_sc[...] = m_new

        # Stash raw logits into this tile's slot of the resident output block.
        start = pl.multiple_of(j * tv, tv)
        o_ref[:, pl.ds(start, tv)] = logits.astype(o_ref.dtype)

        @pl.when(j == nv - 1)
        def _finalize():
            lse = m_sc[...] + jnp.log(l_sc[...])  # (tm, 1)
            o_ref[...] = o_ref[...] - lse

    return kernel


def _vmem_limit_bytes(tm, tv, d, vpad, in_bytes):
    est = 2 * tv * d * in_bytes        # weight tile, double buffered
    est += 2 * tm * d * in_bytes       # x tile
    est += 2 * tv * 4                  # bias tile (f32)
    est += 2 * tm * vpad * 4           # resident f32 output row block
    est += 2 * tm * 4                  # running max / sum scratch
    est = int(est * 1.3) + (2 << 20)   # headroom for compiler internals
    # 32 MiB floor; 48 MiB ceiling is safe on all generations (v7x phys = 64).
    return max(32 << 20, min(48 << 20, est))


def generator_forward(x, weight, bias, *, tm=256, tv=2048, cast_to_bf16=True):
    """Forward of Generator.

    x      : [N, D] float32  (rows of the model output)
    weight : [V, D] float32  (PyTorch nn.Linear layout, NOT transposed)
    bias   : [V]    float32
    returns: [N, V] float32  log_softmax(x @ weight.T + bias, axis=1)
    """
    N, D = x.shape
    V, D2 = weight.shape
    assert D == D2, "weight must be [vocab, model_dim]"

    in_dtype = jnp.bfloat16 if cast_to_bf16 else jnp.float32
    in_bytes = 2 if cast_to_bf16 else 4

    # ---- tile sizes -------------------------------------------------------
    # Vocab tile: lane-aligned (multiple of 128, ideally 256 for v6e/v7x MXU).
    tv = min(_round_up(tv, 128), _round_up(V, 128))
    vpad = _round_up(V, tv)

    # Row tile: MXU-filling (up to 256) but capped so the resident
    # (tm, Vpad) f32 output block (x2 buffers) stays within ~24 MiB of VMEM.
    tm = min(_round_up(tm, 8), _round_up(N, 8))
    tm_cap = max(8, ((24 << 20) // (vpad * 4 * 2)) // 8 * 8)
    tm = min(tm, tm_cap)
    npad = _round_up(N, tm)

    # ---- pad / cast inputs (no weight transpose is ever materialized) -----
    x_p = x.astype(in_dtype)
    if npad != N:
        x_p = jnp.pad(x_p, ((0, npad - N), (0, 0)))
    w_p = weight.astype(in_dtype)
    if vpad != V:
        w_p = jnp.pad(w_p, ((0, vpad - V), (0, 0)))
    b_p = bias.astype(jnp.float32)
    if vpad != V:
        # padded vocab columns get a huge negative bias so they do not
        # perturb the online max / sum-of-exp.
        b_p = jnp.pad(b_p, (0, vpad - V), constant_values=_NEG_BIG)
    b_p = b_p.reshape(1, vpad)

    grid = (npad // tm, vpad // tv)

    out = pl.pallas_call(
        _make_kernel(tv),
        out_shape=jax.ShapeDtypeStruct((npad, vpad), jnp.float32),
        grid_spec=pltpu.PrefetchScalarGridSpec(
            num_scalar_prefetch=0,
            grid=grid,
            in_specs=[
                pl.BlockSpec((tm, D), lambda i, j: (i, 0)),   # x row tile
                pl.BlockSpec((tv, D), lambda i, j: (j, 0)),   # streamed weight tile
                pl.BlockSpec((1, tv), lambda i, j: (0, j)),   # bias tile
            ],
            # Output row block is revisited across the vocab axis (constant
            # block index along j) -> stays resident in VMEM until i changes.
            out_specs=pl.BlockSpec((tm, vpad), lambda i, j: (i, 0)),
            scratch_shapes=[
                pltpu.VMEM((tm, 1), jnp.float32),  # running max
                pltpu.VMEM((tm, 1), jnp.float32),  # running sum of exp
            ],
        ),
        compiler_params=pltpu.CompilerParams(
            dimension_semantics=("parallel", "arbitrary"),
            vmem_limit_bytes=_vmem_limit_bytes(tm, tv, D, vpad, in_bytes),
        ),
    )(x_p, w_p, b_p)

    if npad != N or vpad != V:
        out = out[:N, :V]
    return out


if __name__ == "__main__":
    # Small shapes consistent with the module: x is [N, model_dim].
    N, MODEL_DIM, VOCAB = 16, 32, 128

    key = jax.random.PRNGKey(0)
    kx, kw, kb = jax.random.split(key, 3)

    x = jax.random.normal(kx, (N, MODEL_DIM), dtype=jnp.float32)
    bound = 1.0 / (MODEL_DIM ** 0.5)
    weight = jax.random.uniform(kw, (VOCAB, MODEL_DIM), jnp.float32, -bound, bound)
    bias = jax.random.uniform(kb, (VOCAB,), jnp.float32, -bound, bound)

    out = jax.jit(generator_forward)(x, weight, bias)
    out = jax.block_until_ready(out)

    assert out.shape == (N, VOCAB) and out.dtype == jnp.float32

    # Matched-precision reference (bf16-rounded inputs, f32 accumulation).
    xb = x.astype(jnp.bfloat16).astype(jnp.float32)
    wb = weight.astype(jnp.bfloat16).astype(jnp.float32)
    ref_matched = jax.nn.log_softmax(xb @ wb.T + bias, axis=1)
    # Module-semantics f32 reference (bf16 cast introduces ~1e-3 level error).
    ref_f32 = jax.nn.log_softmax(x @ weight.T + bias, axis=1)

    assert jnp.allclose(out, ref_matched, atol=2e-3, rtol=2e-3), \
        "mismatch vs matched-precision reference"
    assert jnp.allclose(out, ref_f32, atol=5e-2, rtol=5e-2), \
        "mismatch vs f32 reference"

    print("KERNEL_OK")
</pallas_src>

<mosaic_0001>
module attributes {stable_mosaic.version = 11 : i64} {
  func.func @kernel(%arg0: i32, %arg1: i32, %arg2: memref<16x32xbf16, #tpu.memory_space<vmem>>, %arg3: memref<128x32xbf16, #tpu.memory_space<vmem>>, %arg4: memref<1x128xf32, #tpu.memory_space<vmem>>, %arg5: memref<16x128xf32, #tpu.memory_space<vmem>>, %arg6: memref<16x1xf32, #tpu.memory_space<vmem>>, %arg7: memref<16x1xf32, #tpu.memory_space<vmem>>) attributes {dimension_semantics = [#tpu.dimension_semantics<parallel>, #tpu.dimension_semantics<arbitrary>], iteration_bounds = array<i64: 1, 1>, scalar_prefetch = 0 : i64, scratch_operands = 2 : i64, tpu.core_type = #tpu.core_type<tc>, window_params = [{transform_indices = @transform_0, window_bounds = array<i64: 16, 32>}, {transform_indices = @transform_1, window_bounds = array<i64: 128, 32>}, {transform_indices = @transform_2, window_bounds = array<i64: 1, 128>}, {transform_indices = @transform_3, window_bounds = array<i64: 16, 128>}]} {
    %c0_i32 = arith.constant 0 : i32
    %0 = arith.cmpi eq, %arg1, %c0_i32 : i32
    %1 = arith.extui %0 : i1 to i32
    %c0_i32_0 = arith.constant 0 : i32
    %2 = arith.cmpi ne, %1, %c0_i32_0 : i32
    scf.if %2 {
      %cst_19 = arith.constant 0xFF800000 : f32
      %32 = vector.broadcast %cst_19 : f32 to vector<16x1xf32>
      %c0_20 = arith.constant 0 : index
      %c0_21 = arith.constant 0 : index
      %33 = vector.load %arg6[%c0_20, %c0_21] : memref<16x1xf32, #tpu.memory_space<vmem>>, vector<16x1xf32>
      tpu.vector_store %arg6[%c0_20, %c0_21], %32 {strides = array<i32>} : memref<16x1xf32, #tpu.memory_space<vmem>>, vector<16x1xf32>,
      %cst_22 = arith.constant 0.000000e+00 : f32
      %34 = vector.broadcast %cst_22 : f32 to vector<16x1xf32>
      %c0_23 = arith.constant 0 : index
      %c0_24 = arith.constant 0 : index
      %35 = vector.load %arg7[%c0_23, %c0_24] : memref<16x1xf32, #tpu.memory_space<vmem>>, vector<16x1xf32>
      tpu.vector_store %arg7[%c0_23, %c0_24], %34 {strides = array<i32>} : memref<16x1xf32, #tpu.memory_space<vmem>>, vector<16x1xf32>,
    } else {
    }
    %c0 = arith.constant 0 : index
    %c0_1 = arith.constant 0 : index
    %3 = vector.load %arg2[%c0, %c0_1] : memref<16x32xbf16, #tpu.memory_space<vmem>>, vector<16x32xbf16>
    %c0_2 = arith.constant 0 : index
    %c0_3 = arith.constant 0 : index
    %4 = vector.load %arg3[%c0_2, %c0_3] : memref<128x32xbf16, #tpu.memory_space<vmem>>, vector<128x32xbf16>
    %cst = arith.constant dense<0.000000e+00> : vector<16x128xf32>
    %5 = tpu.matmul %3, %4, %cst {dimension_numbers = #tpu.dot_dimension_numbers<[1], [1], [0], [0], [0, 0, 1, 0], [], []>} : vector<16x32xbf16>, vector<128x32xbf16>, vector<16x128xf32> -> vector<16x128xf32>
    %c0_4 = arith.constant 0 : index
    %c0_5 = arith.constant 0 : index
    %6 = vector.load %arg4[%c0_4, %c0_5] : memref<1x128xf32, #tpu.memory_space<vmem>>, vector<1x128xf32>
    %7 = vector.broadcast %6 : vector<1x128xf32> to vector<16x128xf32>
    %8 = arith.addf %5, %7 : vector<16x128xf32>
    %c0_6 = arith.constant 0 : index
    %c0_7 = arith.constant 0 : index
    %9 = vector.load %arg6[%c0_6, %c0_7] : memref<16x1xf32, #tpu.memory_space<vmem>>, vector<16x1xf32>
    %cst_8 = arith.constant dense<0xFF800000> : vector<16xf32>
    %10 = vector.multi_reduction <maximumf>, %8, %cst_8 [1] : vector<16x128xf32> to vector<16xf32>
    %11 = vector.shape_cast %10 : vector<16xf32> to vector<16x1xf32>
    %12 = arith.maximumf %9, %11 : vector<16x1xf32>
    %13 = arith.subf %9, %12 : vector<16x1xf32>
    %14 = math.exp %13 : vector<16x1xf32>
    %c0_9 = arith.constant 0 : index
    %c0_10 = arith.constant 0 : index
    %15 = vector.load %arg7[%c0_9, %c0_10] : memref<16x1xf32, #tpu.memory_space<vmem>>, vector<16x1xf32>
    %16 = arith.mulf %15, %14 : vector<16x1xf32>
    %17 = vector.broadcast %12 : vector<16x1xf32> to vector<16x128xf32>
    %18 = arith.subf %8, %17 : vector<16x128xf32>
    %19 = math.exp %18 : vector<16x128xf32>
    %cst_11 = arith.constant dense<0.000000e+00> : vector<16xf32>
    %20 = vector.multi_reduction <add>, %19, %cst_11 [1] : vector<16x128xf32> to vector<16xf32>
    %21 = vector.shape_cast %20 : vector<16xf32> to vector<16x1xf32>
    %22 = arith.addf %16, %21 : vector<16x1xf32>
    %c0_12 = arith.constant 0 : index
    %c0_13 = arith.constant 0 : index
    %23 = vector.load %arg7[%c0_12, %c0_13] : memref<16x1xf32, #tpu.memory_space<vmem>>, vector<16x1xf32>
    tpu.vector_store %arg7[%c0_12, %c0_13], %22 {strides = array<i32>} : memref<16x1xf32, #tpu.memory_space<vmem>>, vector<16x1xf32>,
    %c0_14 = arith.constant 0 : index
    %c0_15 = arith.constant 0 : index
    %24 = vector.load %arg6[%c0_14, %c0_15] : memref<16x1xf32, #tpu.memory_space<vmem>>, vector<16x1xf32>
    tpu.vector_store %arg6[%c0_14, %c0_15], %12 {strides = array<i32>} : memref<16x1xf32, #tpu.memory_space<vmem>>, vector<16x1xf32>,
    %c128_i32 = arith.constant 128 : i32
    %25 = arith.muli %arg1, %c128_i32 : i32
    %26 = tpu.assume_multiple %25, 128 : i32
    %c0_16 = arith.constant 0 : index
    %27 = arith.index_cast %26 : i32 to index
    %28 = vector.load %arg5[%c0_16, %27] : memref<16x128xf32, #tpu.memory_space<vmem>>, vector<16x128xf32>
    tpu.vector_store %arg5[%c0_16, %27], %8 {strides = array<i32>} : memref<16x128xf32, #tpu.memory_space<vmem>>, vector<16x128xf32>,
    %c0_i32_17 = arith.constant 0 : i32
    %29 = arith.cmpi eq, %arg1, %c0_i32_17 : i32
    %30 = arith.extui %29 : i1 to i32
    %c0_i32_18 = arith.constant 0 : i32
    %31 = arith.cmpi ne, %30, %c0_i32_18 : i32
    scf.if %31 {
      %c0_19 = arith.constant 0 : index
      %c0_20 = arith.constant 0 : index
      %32 = vector.load %arg6[%c0_19, %c0_20] : memref<16x1xf32, #tpu.memory_space<vmem>>, vector<16x1xf32>
      %c0_21 = arith.constant 0 : index
      %c0_22 = arith.constant 0 : index
      %33 = vector.load %arg7[%c0_21, %c0_22] : memref<16x1xf32, #tpu.memory_space<vmem>>, vector<16x1xf32>
      %34 = math.log %33 : vector<16x1xf32>
      %35 = arith.addf %32, %34 : vector<16x1xf32>
      %c0_23 = arith.constant 0 : index
      %c0_24 = arith.constant 0 : index
      %36 = vector.load %arg5[%c0_23, %c0_24] : memref<16x128xf32, #tpu.memory_space<vmem>>, vector<16x128xf32>
      %37 = vector.broadcast %35 : vector<16x1xf32> to vector<16x128xf32>
      %38 = arith.subf %36, %37 : vector<16x128xf32>
      %c0_25 = arith.constant 0 : index
      %c0_26 = arith.constant 0 : index
      %39 = vector.load %arg5[%c0_25, %c0_26] : memref<16x128xf32, #tpu.memory_space<vmem>>, vector<16x128xf32>
      tpu.vector_store %arg5[%c0_25, %c0_26], %38 {strides = array<i32>} : memref<16x128xf32, #tpu.memory_space<vmem>>, vector<16x128xf32>,
    } else {
    }
    return
  }
  func.func @transform_0(%arg0: i32, %arg1: i32) -> (i32, i32) {
    %c0_i32 = arith.constant 0 : i32
    %c0_i32_0 = arith.constant 0 : i32
    return %arg0, %c0_i32 : i32, i32
  }
  func.func @transform_1(%arg0: i32, %arg1: i32) -> (i32, i32) {
    %c0_i32 = arith.constant 0 : i32
    %c0_i32_0 = arith.constant 0 : i32
    return %arg1, %c0_i32 : i32, i32
  }
  func.func @transform_2(%arg0: i32, %arg1: i32) -> (i32, i32) {
    %c0_i32 = arith.constant 0 : i32
    %c0_i32_0 = arith.constant 0 : i32
    return %c0_i32, %arg1 : i32, i32
  }
  func.func @transform_3(%arg0: i32, %arg1: i32) -> (i32, i32) {
    %c0_i32 = arith.constant 0 : i32
    %c0_i32_0 = arith.constant 0 : i32
    return %arg0, %c0_i32 : i32, i32
  }
}

</mosaic_0001>

<bundles_post_ra>
// kernel: generator_forward.1
= control target key start
LH: loop header
LB: loop body
LE: loop exit
PB: predicated region body
PF: predicated region fallthrough
CT: control target
= control target key end

     0   :  { %v353_v1 = vmov 0.0   ;;  %vm95_vm0 = vcmask 261120   ;;  %vm354_vm1 = vmmov 0   ;;  %s440_s0 = inlined_call_operand.vmem [shape: bf16[16,32], index: 0, kind: input, shape index: {}]   ;;  %s441_s1 = inlined_call_operand.vmem [shape: bf16[128,32], index: 1, kind: input, shape index: {}]   ;;  %s442_s2 = inlined_call_operand.vmem [shape: f32[1,128], index: 2, kind: input, shape index: {}]   ;;  %s443_s3 = inlined_call_operand.hbm [shape: f32[16,128], index: 3, kind: output, shape index: {}]  }
   0x1   :  { %v310_v0 = vld [vmem:[%s441_s1 + $0x38] sm:$0xff]   ;;  %281 = vmatprep.subr.bf16.mxu0 %v353_v1  ;;  %v311_v3 = vld [vmem:[%s441_s1 + $0x30] sm:$0xff]   ;;  %297 = vmatprep.mubr.msk.bf16.mxu0 %vm354_vm1, %v353_v1 }
   0x2   :  { %v121_v2 = vsel %vm95_vm0, %v310_v0, 0  ;;  %v118_v4 = vsel %vm95_vm0, %v311_v3, 0 }
   0x3   :  { %282 = vmatpush3.bf16.xpose.msra.mxu0 %v121_v2 }
   0x4   :  { %283 = vmatprep.subr.bf16.mxu0 %v353_v1 }
   0x5   :  { %8 = vsyncpa [#allocation5], 0  ;;  %v312_v5 = vld [vmem:[%s441_s1 + $0x28] sm:$0xff]   ;;  %v313_v7 = vld [vmem:[%s441_s1 + $0x20] sm:$0xff]   ;;  %vm20_vm2 = vcmask 7168   ;;  %v355_v24 = vmov -inf  }
   0x6   :  { %v115_v6 = vsel %vm95_vm0, %v312_v5, 0  ;;  %v112_v8 = vsel %vm95_vm0, %v313_v7, 0  ;;  %v314_v9 = vld [vmem:[%s441_s1 + $0x18] sm:$0xff]   ;;  %v315_v11 = vld [vmem:[%s441_s1 + $0x10] sm:$0xff]   ;;  %v316_v13 = vld [vmem:[%s441_s1 + $0x8] sm:$0xff]   ;;  %21 = vst.msk [vmem:[#allocation2] sm:$0xff] %vm20_vm2, %v355_v24 }
   0x7   :  { %v109_v10 = vsel %vm95_vm0, %v314_v9, 0  ;;  %v106_v12 = vsel %vm95_vm0, %v315_v11, 0  ;;  %v103_v14 = vsel %vm95_vm0, %v316_v13, 0  ;;  %v317_v15 = vld [vmem:[%s441_s1] sm:$0xff]   ;;  %22 = vst.msk [vmem:[#allocation2 + $0x8] sm:$0xff] %vm20_vm2, %v355_v24  ;;  %23 = vst.msk [vmem:[#allocation3] sm:$0xff] %vm20_vm2, %v353_v1 }
   0x8   :  { %v100_v16 = vsel %vm95_vm0, %v317_v15, 0  ;;  %v318_v17 = vld [vmem:[%s440_s0] sm:$0xff]   ;;  %24 = vst.msk [vmem:[#allocation3 + $0x8] sm:$0xff] %vm20_vm2, %v353_v1  ;;  %v356_v26 = vmov 0   ;;  %s357_s0 = smov [#allocation4]  }
   0x9   :  { %v261_v18 = vld [vmem:[%s442_s2] ss:$0 sm:$0xff]  ;;  %308 = vset.pattern.permute.xlu1 %v356_v26  ;;  %309 = vset.pattern.permute.xlu0 %v356_v26  ;;  %s249_s1 = sshll.u32 %s357_s0, 4  ;;  %s250_s1 = int_to_ptr.vmem [resolvable:$true] %s249_s1 }
   0xa   :  { %s331_s2 = scalar_lea.vmem %s250_s1, 256  ;;  %p336_p1 = scmp.lt.s32.totalorder %s250_s1, %s250_s1 }
   0xb   :  { %284 = vmatpush3.bf16.xpose.msra.mxu0 %v118_v4  ;;  %p332_p0 = scmp.ne.s32.totalorder %s250_s1, %s331_s2  ;;  %p337_p2 = scmp.lt.s32.totalorder %s331_s2, %s331_s2 }
   0xc   :  { %285 = vmatprep.subr.bf16.mxu0 %v353_v1 }
   0xd   :  { %v164_v27 = vld [vmem:[#allocation2] sm:$0xff]  ;;  %p338_p3 = por %p337_p2, %p336_p1 }
   0xe   :  { %v165_v30 = vld [vmem:[#allocation2 + $0x8] sm:$0xff]  ;;  %v178_v46 = vld [vmem:[#allocation3] sm:$0xff] }
   0xf   :  { %v179_v50 = vld [vmem:[#allocation3 + $0x8] sm:$0xff]  ;;  %p339_p4 = pnand %p338_p3, %p332_p0 }
  0x13   :  { %286 = vmatpush3.bf16.xpose.msra.mxu0 %v115_v6 }
  0x14   :  { %287 = vmatprep.subr.bf16.mxu0 %v353_v1 }
  0x1b   :  { %288 = vmatpush3.bf16.xpose.msra.mxu0 %v112_v8 }
  0x1c   :  { %289 = vmatprep.subr.bf16.mxu0 %v353_v1 }
  0x23   :  { %290 = vmatpush3.bf16.xpose.msra.mxu0 %v109_v10 }
  0x24   :  { %291 = vmatprep.subr.bf16.mxu0 %v353_v1 }
  0x2b   :  { %292 = vmatpush3.bf16.xpose.msra.mxu0 %v106_v12 }
  0x2c   :  { %293 = vmatprep.subr.bf16.mxu0 %v353_v1 }
  0x33   :  { %294 = vmatpush3.bf16.xpose.msra.mxu0 %v103_v14 }
  0x34   :  { %295 = vmatprep.subr.bf16.mxu0 %v353_v1 }
  0x3b   :  { %296 = vmatpush3.bf16.xpose.msra.mxu0 %v100_v16 }
  0x42   :  { %298 = vmatmul.mubr.msk.bf16.vlgmr.msra.gmra.mxu0 %vm95_vm0, %v318_v17 }
 0x102   :  { %v157_v19 = vpop.f32.mrf.mxu0 }
 0x103   :  { %v419_v20 = vadd.f32 %v261_v18, %v157_v19 }
 0x104   :  { %v299_v21 = vpop.f32.mrf.mxu0 }
 0x105   :  { %166 = vmax.xlane.f32.xlu0 %v419_v20 }
 0x106   :  { %v160_v22 = vpop.f32.mrf.mxu0 }
 0x107   :  { %v422_v23 = vadd.f32 %v261_v18, %v160_v22 }
 0x108   :  { %v300_v25 = vpop.f32.mrf.mxu0 }
 0x109   :  { %168 = vmax.xlane.f32.xlu0 %v422_v23 }
 0x18e   :  { %v167_v28 = vpop.xlane.xlu0 %166 }
 0x18f   :  { %v170_v29 = vmax.f32 %v164_v27, %v167_v28 }
 0x191   :  { %v172_v31 = vsub.f32 %v164_v27, %v170_v29  ;;  %207 = vst.msk [vmem:[#allocation2] sm:$0xff] %vm20_vm2, %v170_v29  ;;  %184 = vperm.xlu1 %308, %v170_v29  }
 0x192   :  { %v169_v32 = vpop.xlane.xlu0 %168 }
 0x193   :  { %v171_v33 = vmax.f32 %v165_v30, %v169_v32  ;;  %v174_v43 = vmul.f32 1.442695, %v172_v31 }
 0x195   :  { %v173_v34 = vsub.f32 %v165_v30, %v171_v33  ;;  %208 = vst.msk [vmem:[#allocation2 + $0x8] sm:$0xff] %vm20_vm2, %v171_v33  ;;  %189 = vperm.xlu1 %308, %v171_v33  }
 0x197   :  { %v176_v44 = vmul.f32 1.442695, %v173_v34 }
 0x198   :  { %v218_v59 = vld [vmem:[#allocation2] sm:$0xff] }
 0x19c   :  { %v219_v63 = vld [vmem:[#allocation2 + $0x8] sm:$0xff] }
 0x20c   :  { %v185_v35 = vpop.permute.xlu1 %184 }
 0x20d   :  { %v192_v36 = vsub.f32 %v419_v20, %v185_v35 }
 0x20f   :  { %v194_v37 = vmul.f32 1.442695, %v192_v36 }
 0x210   :  { %v190_v38 = vpop.permute.xlu1 %189 }
 0x211   :  { %319 = vpow2.f32 %v194_v37  ;;  %v193_v39 = vsub.f32 %v422_v23, %v190_v38 }
 0x213   :  { %v196_v40 = vmul.f32 1.442695, %v193_v39 }
 0x215   :  { %321 = vpow2.f32 %v196_v40 }
 0x216   :  { %323 = vpow2.f32 %v174_v43 }
 0x217   :  { %325 = vpow2.f32 %v176_v44 }
 0x21e   :  { %v320_v41 = vpop.eup %319 }
 0x21f   :  { %198 = vadd.xlane.f32.xlu0 %v320_v41 }
 0x222   :  { %v322_v42 = vpop.eup %321 }
 0x223   :  { %200 = vadd.xlane.f32.xlu1 %v322_v42  ;;  %v324_v45 = vpop.eup %323 }
 0x224   :  { %v180_v47 = vmul.f32 %v324_v45, %v178_v46  ;;  %v326_v48 = vpop.eup %325 }
 0x225   :  { %v181_v52 = vmul.f32 %v326_v48, %v179_v50 }
 0x2a8   :  { %v199_v49 = vpop.xlane.xlu0 %198 }
 0x2a9   :  { %v202_v51 = vadd.f32 %v199_v49, %v180_v47 }
 0x2ab   :  { %205 = vst.msk [vmem:[#allocation3] sm:$0xff] %vm20_vm2, %v202_v51 }
 0x2ac   :  { %v201_v53 = vpop.xlane.xlu1 %200 }
 0x2ad   :  { %v203_v54 = vadd.f32 %v201_v53, %v181_v52 }
 0x2af   :  { %206 = vst.msk [vmem:[#allocation3 + $0x8] sm:$0xff] %vm20_vm2, %v203_v54 }
 0x2b2   :  { %v220_v55 = vld [vmem:[#allocation3] sm:$0xff] }
 0x2b3   :  { %327 = vlog2.f32 %v220_v55 }
 0x2b6   :  { %v221_v56 = vld [vmem:[#allocation3 + $0x8] sm:$0xff] }
 0x2b7   :  { %329 = vlog2.f32 %v221_v56 }
 0x2c0   :  { %v328_v57 = vpop.eup %327 }
 0x2c1   :  { %v223_v58 = vmul.f32 0.6931472, %v328_v57 }
 0x2c3   :  { %v226_v60 = vadd.f32 %v223_v58, %v218_v59 }
 0x2c4   :  { %v330_v61 = vpop.eup %329 }
 0x2c5   :  { %232 = vperm.xlu0 %309, %v226_v60   ;;  %v225_v62 = vmul.f32 0.6931472, %v330_v61 }
 0x2c7   :  { %v227_v0 = vadd.f32 %v225_v62, %v219_v63 }
 0x2c9   :  { %237 = vperm.xlu1 %308, %v227_v0  }
 0x340   :  { %v233_v1 = vpop.permute.xlu0 %232 }
 0x341   :  { %v240_v2 = vsub.f32 %v419_v20, %v233_v1 }
 0x343   :  { %242 = vst [vmem:[#allocation4] sm:$0xff] %v240_v2 }
 0x344   :  { %v238_v3 = vpop.permute.xlu1 %237 }
 0x345   :  { %v241_v4 = vsub.f32 %v422_v23, %v238_v3 }
 0x347   :  { %243 = vst [vmem:[#allocation4 + $0x8] sm:$0xff] %v241_v4 }
 0x348   :  { %342 = shalt.err (!%p339_p4)
}
 0x349   :  { %s358_s5 = smov 128   ;;  %s359_s6 = smov 8  }
 0x34a   :  { %255 = dma.vmem_to_hbm [thread:$0]  %s250_s1, 256, %s443_s3, [#allocation5], %s358_s5, %s358_s5, %s359_s6  }
 0x34b   :  { %351 = dma.done.wait [#allocation5], 256  }
 0x34c   :  { %352 = vsyncadd [#allocation5], 4294967040 }
 0x34d   :  { %259 = vsyncpa [#allocation5], 1 }

</bundles_post_ra>
